<compile_context>
chip_gen: v7x
topology: tpu7x:2x2x1
jax: 0.10.0
libtpu: 0.0.40
codegen_flags: <defaults>
</compile_context>

<pallas_src>
import math

import jax
import jax.numpy as jnp
from jax import lax
from jax.experimental import pallas as pl
from jax.experimental.pallas import tpu as pltpu

LANE = 128         # TPU lane width; every in-kernel feature axis is padded to this.
NUM_PARAMS = 21    # mlp output width (pred_para)
OUT_DIM = 20       # pred_output width after the .reshape(B,20,7).mean(-1)


def _round_up(x, m):
    return (x + m - 1) // m * m


# ---------------------------------------------------------------------------
# Pallas kernel: MLP + fused (final_layer @ block-average) + sigmoid head
# ---------------------------------------------------------------------------
def _nn_only_kernel(x_ref,
                    w1_ref, b1_ref,
                    w2_ref, b2_ref,
                    w3_ref, b3_ref,
                    w4_ref, b4_ref,
                    w5a_ref, b5a_ref,
                    out_ref):
    f32 = jnp.float32
    x = x_ref[...]                                                     # (TB,128) bf16

    # hidden Linear + ReLU layers (weights pre-transposed to (in, out), bf16)
    h = jnp.dot(x, w1_ref[...], preferred_element_type=f32) + b1_ref[...]
    h = jnp.maximum(h, 0.0).astype(jnp.bfloat16)
    h = jnp.dot(h, w2_ref[...], preferred_element_type=f32) + b2_ref[...]
    h = jnp.maximum(h, 0.0).astype(jnp.bfloat16)
    h = jnp.dot(h, w3_ref[...], preferred_element_type=f32) + b3_ref[...]
    h = jnp.maximum(h, 0.0).astype(jnp.bfloat16)

    # mlp.layer_output -> pred_para; only lanes 0..20 are "real", rest are 0
    pred_para = jnp.dot(h, w4_ref[...], preferred_element_type=f32) + b4_ref[...]

    # final_layer fused with the (140 -> 20) block-averaging matrix, with its
    # columns pre-shifted to lanes 21..40:
    #   fused = relu(pred_para) @ (W5^T @ avg)_shift + (b5 @ avg)_shift
    a = jnp.maximum(pred_para, 0.0).astype(jnp.bfloat16)
    fused = jnp.dot(a, w5a_ref[...], preferred_element_type=f32) + b5a_ref[...]

    # sigmoid(pred_para) head: valid in lanes 0..20
    sig = jax.nn.sigmoid(pred_para)

    # Pack both heads into one lane-dense 128-wide f32 slab:
    #   lanes [0, 21)  -> sigmoid(pred_para)
    #   lanes [21, 41) -> fused pred_output
    #   lanes >= 41    -> zeros (fused is zero there)
    col = lax.broadcasted_iota(jnp.int32, fused.shape, 1)
    out_ref[...] = jnp.where(col < NUM_PARAMS, sig, fused)


def nn_only_pallas(new_input, kernel_params, *, block_b=512):
    """new_input: (B, Din) f32. kernel_params: padded/bf16 weights from make_params."""
    B, din = new_input.shape
    assert din <= LANE
    tb = min(block_b, _round_up(B, 8))          # batch tile (multiple of 8 sublanes)
    bp = _round_up(B, tb)                       # padded batch (grid divides evenly)

    x = (jnp.zeros((bp, LANE), jnp.float32)
         .at[:B, :din].set(new_input)
         .astype(jnp.bfloat16))

    x_spec = pl.BlockSpec((tb, LANE), lambda i: (i, 0))
    w_spec = pl.BlockSpec((LANE, LANE), lambda i: (0, 0))   # weight-resident
    b_spec = pl.BlockSpec((1, LANE), lambda i: (0, 0))      # bias-resident
    out_spec = pl.BlockSpec((tb, LANE), lambda i: (i, 0))

    in_specs = [x_spec] + [w_spec, b_spec] * 5
    out_shape = jax.ShapeDtypeStruct((bp, LANE), jnp.float32)  # packed sig|pred_out

    weight_bytes = sum(int(p.size) * p.dtype.itemsize for p in kernel_params)
    cost = pl.CostEstimate(
        flops=2 * bp * 5 * LANE * LANE,
        transcendentals=bp * LANE,
        bytes_accessed=bp * LANE * 2 + bp * LANE * 4 + weight_bytes,
    )

    comb = pl.pallas_call(
        _nn_only_kernel,
        out_shape=out_shape,
        grid=(bp // tb,),
        in_specs=in_specs,
        out_specs=out_spec,
        compiler_params=pltpu.CompilerParams(
            dimension_semantics=("parallel",)),
        cost_estimate=cost,
    )(x, *kernel_params)

    sig_para = comb[:B, :NUM_PARAMS]
    pred_out = comb[:B, NUM_PARAMS:NUM_PARAMS + OUT_DIM]
    return pred_out, sig_para


# ---------------------------------------------------------------------------
# Deterministic parameter initialization (mirrors the PyTorch __init__)
# ---------------------------------------------------------------------------
def _xavier_uniform(key, out_dim, in_dim, gain):
    bound = gain * math.sqrt(6.0 / (in_dim + out_dim))
    # PyTorch weight layout (out, in)
    return jax.random.uniform(key, (out_dim, in_dim), jnp.float32, -bound, bound)


def make_params(key, new_input_size, width, num_params, output_dim):
    assert width == LANE, "kernel assumes width == 128"
    assert output_dim % OUT_DIM == 0
    group = output_dim // OUT_DIM                 # 7
    gain_relu = math.sqrt(2.0)                    # nn.init.calculate_gain('relu')
    gain_sigmoid = 1.0                            # nn.init.calculate_gain('sigmoid')
    ks = jax.random.split(key, 5)
    w1 = _xavier_uniform(ks[0], width, new_input_size, gain_relu)    # (128, 11)
    w2 = _xavier_uniform(ks[1], width, width, gain_relu)             # (128, 128)
    w3 = _xavier_uniform(ks[2], width, width, gain_relu)             # (128, 128)
    w4 = _xavier_uniform(ks[3], num_params, width, gain_sigmoid)     # (21, 128)
    w5 = _xavier_uniform(ks[4], output_dim, num_params, 1.0)         # (140, 21)
    b1 = jnp.zeros((width,), jnp.float32)
    b2 = jnp.zeros((width,), jnp.float32)
    b3 = jnp.zeros((width,), jnp.float32)
    b4 = jnp.zeros((num_params,), jnp.float32)
    b5 = jnp.zeros((output_dim,), jnp.float32)

    ref_params = (w1, b1, w2, b2, w3, b3, w4, b4, w5, b5)            # fp32, torch layout

    # reshape(B,20,7).mean(-1) expressed as a (140,20) block-averaging matrix,
    # then algebraically fused into final_layer.
    avg = jnp.repeat(jnp.eye(OUT_DIM, dtype=jnp.float32), group, axis=0) / group  # (140,20)
    w5a = w5.T @ avg                                                  # (21, 20)
    b5a = b5 @ avg                                                    # (20,)

    def pad2(a, rows, cols, col_off=0):
        out = jnp.zeros((rows, cols), jnp.float32)
        return out.at[:a.shape[0], col_off:col_off + a.shape[1]].set(a)

    kernel_params = (
        pad2(w1.T, LANE, width).astype(jnp.bfloat16),   # (128,128) zero-padded K rows
        pad2(b1[None, :], 1, LANE),                      # biases stay f32
        pad2(w2.T, width, width).astype(jnp.bfloat16),
        pad2(b2[None, :], 1, LANE),
        pad2(w3.T, width, width).astype(jnp.bfloat16),
        pad2(b3[None, :], 1, LANE),
        pad2(w4.T, width, LANE).astype(jnp.bfloat16),   # (128,128), cols >= 21 zero
        pad2(b4[None, :], 1, LANE),
        # fused final_layer+mean, columns shifted to lanes [21, 41) so the two
        # heads can be packed into a single lane-dense output slab.
        pad2(w5a, LANE, LANE, col_off=NUM_PARAMS).astype(jnp.bfloat16),
        pad2(b5a[None, :], 1, LANE, col_off=NUM_PARAMS),
    )
    return kernel_params, ref_params


# ---------------------------------------------------------------------------
# Glue: embedding lookup, L2-normalize, feature concat (plain JAX)
# ---------------------------------------------------------------------------
def build_new_input(input_var, emb_table, non_categorical_indices, cat_idx):
    predictor = input_var[:, :, 0, 0]                              # (B, C)
    ids = predictor[:, cat_idx].astype(jnp.int32)
    emb = jnp.take(emb_table, ids, axis=0)                         # (B, emb_dim)
    norm = jnp.sqrt(jnp.sum(emb * emb, axis=1, keepdims=True))     # F.normalize p=2
    emb = emb / jnp.maximum(norm, 1e-12)
    features = predictor[:, jnp.array(non_categorical_indices)]    # (B, n_noncat)
    return jnp.concatenate([features, emb], axis=1).astype(jnp.float32)


def forward(input_var, emb_table, kernel_params, non_categorical_indices, cat_idx,
            block_b=512):
    new_input = build_new_input(input_var, emb_table, non_categorical_indices, cat_idx)
    return nn_only_pallas(new_input, kernel_params, block_b=block_b)


# ---------------------------------------------------------------------------
# References for correctness checks
# ---------------------------------------------------------------------------
def reference_fp32(new_input, ref_params):
    """Exact fp32 mirror of the PyTorch forward (unfused final layer + mean)."""
    w1, b1, w2, b2, w3, b3, w4, b4, w5, b5 = ref_params
    h = jnp.maximum(new_input @ w1.T + b1, 0.0)
    h = jnp.maximum(h @ w2.T + b2, 0.0)
    h = jnp.maximum(h @ w3.T + b3, 0.0)
    pred_para = h @ w4.T + b4
    pred_full = jnp.maximum(pred_para, 0.0) @ w5.T + b5
    pred_out = pred_full.reshape(pred_full.shape[0], OUT_DIM, -1).mean(axis=2)
    return pred_out, jax.nn.sigmoid(pred_para)


def reference_bf16(new_input, kernel_params):
    """Same bf16-input / f32-accumulate arithmetic as the kernel, in plain JAX."""
    w1, b1, w2, b2, w3, b3, w4, b4, w5a, b5a = kernel_params
    B, din = new_input.shape
    x = (jnp.zeros((B, LANE), jnp.float32).at[:, :din].set(new_input)
         .astype(jnp.bfloat16))

    def mm(a, b):
        return jnp.dot(a, b, preferred_element_type=jnp.float32)

    h = jnp.maximum(mm(x, w1) + b1, 0.0).astype(jnp.bfloat16)
    h = jnp.maximum(mm(h, w2) + b2, 0.0).astype(jnp.bfloat16)
    h = jnp.maximum(mm(h, w3) + b3, 0.0).astype(jnp.bfloat16)
    pred_para = mm(h, w4) + b4
    fused = mm(jnp.maximum(pred_para, 0.0).astype(jnp.bfloat16), w5a) + b5a
    out = fused[:, NUM_PARAMS:NUM_PARAMS + OUT_DIM]
    return out, jax.nn.sigmoid(pred_para)[:, :NUM_PARAMS]


# TODO(synk): GridCellSpatialRelationEncoder (pos_enc='early'/'late') and the
# select_depth branch (whether_predict != 1) depend on external code not in the
# module excerpt; this script covers pos_enc=None, whether_predict=1.

if __name__ == "__main__":
    key = jax.random.PRNGKey(0)

    B = 8                 # batch
    input_vars = 4        # channels of input_var
    H = W = 2             # spatial dims (only [0,0] is read)
    cat_idx = 3           # categorical variable index
    num_embeddings = 5
    emb_dim = 8
    non_categorical_indices = [0, 1, 2]
    new_input_size = len(non_categorical_indices) + emb_dim   # 11
    width, num_params, output_dim = 128, 21, 140

    k_in, k_cat, k_emb, k_par = jax.random.split(key, 4)

    input_var = jax.random.normal(k_in, (B, input_vars, H, W), jnp.float32)
    cat_vals = jax.random.randint(k_cat, (B,), 0, num_embeddings).astype(jnp.float32)
    input_var = input_var.at[:, cat_idx, :, :].set(cat_vals[:, None, None])

    emb_table = jax.random.normal(k_emb, (num_embeddings, emb_dim), jnp.float32)
    kernel_params, ref_params = make_params(k_par, new_input_size, width,
                                            num_params, output_dim)

    wosis_depth = jnp.zeros((B, 1), jnp.float32)   # unused in whether_predict==1 path
    coords = jnp.zeros((B, 2), jnp.float32)        # unused (pos_enc=None)

    pred_out, sig_para = forward(input_var, emb_table, kernel_params,
                                 non_categorical_indices, cat_idx)
    jax.block_until_ready((pred_out, sig_para))

    assert pred_out.shape == (B, OUT_DIM) and sig_para.shape == (B, NUM_PARAMS)

    new_input = build_new_input(input_var, emb_table, non_categorical_indices, cat_idx)

    # Tight check: kernel vs an identically-quantized (bf16 matmul input) JAX reference.
    ref_out_b, ref_sig_b = reference_bf16(new_input, kernel_params)
    assert jnp.allclose(pred_out, ref_out_b, atol=1e-2, rtol=1e-2)
    assert jnp.allclose(sig_para, ref_sig_b, atol=1e-2, rtol=1e-2)

    # Loose check: kernel (bf16 MXU inputs, fused mean) vs exact fp32 module semantics.
    ref_out_f, ref_sig_f = reference_fp32(new_input, ref_params)
    assert jnp.allclose(pred_out, ref_out_f, atol=7e-2, rtol=7e-2)
    assert jnp.allclose(sig_para, ref_sig_f, atol=7e-2, rtol=7e-2)

    print("KERNEL_OK")
</pallas_src>

<mosaic_0001>
module attributes {stable_mosaic.version = 11 : i64} {
  func.func @_nn_only_kernel(%arg0: i32, %arg1: memref<8x128xbf16, #tpu.memory_space<vmem>>, %arg2: memref<128x128xbf16, #tpu.memory_space<vmem>>, %arg3: memref<1x128xf32, #tpu.memory_space<vmem>>, %arg4: memref<128x128xbf16, #tpu.memory_space<vmem>>, %arg5: memref<1x128xf32, #tpu.memory_space<vmem>>, %arg6: memref<128x128xbf16, #tpu.memory_space<vmem>>, %arg7: memref<1x128xf32, #tpu.memory_space<vmem>>, %arg8: memref<128x128xbf16, #tpu.memory_space<vmem>>, %arg9: memref<1x128xf32, #tpu.memory_space<vmem>>, %arg10: memref<128x128xbf16, #tpu.memory_space<vmem>>, %arg11: memref<1x128xf32, #tpu.memory_space<vmem>>, %arg12: memref<8x128xf32, #tpu.memory_space<vmem>>) attributes {dimension_semantics = [#tpu.dimension_semantics<parallel>], iteration_bounds = array<i64: 1>, scalar_prefetch = 0 : i64, scratch_operands = 0 : i64, tpu.core_type = #tpu.core_type<tc>, window_params = [{transform_indices = @transform_0, window_bounds = array<i64: 8, 128>}, {pipeline_mode = #tpu.pipeline_mode<synchronous>, transform_indices = @transform_1, window_bounds = array<i64: 128, 128>}, {pipeline_mode = #tpu.pipeline_mode<synchronous>, transform_indices = @transform_2, window_bounds = array<i64: 1, 128>}, {pipeline_mode = #tpu.pipeline_mode<synchronous>, transform_indices = @transform_3, window_bounds = array<i64: 128, 128>}, {pipeline_mode = #tpu.pipeline_mode<synchronous>, transform_indices = @transform_4, window_bounds = array<i64: 1, 128>}, {pipeline_mode = #tpu.pipeline_mode<synchronous>, transform_indices = @transform_5, window_bounds = array<i64: 128, 128>}, {pipeline_mode = #tpu.pipeline_mode<synchronous>, transform_indices = @transform_6, window_bounds = array<i64: 1, 128>}, {pipeline_mode = #tpu.pipeline_mode<synchronous>, transform_indices = @transform_7, window_bounds = array<i64: 128, 128>}, {pipeline_mode = #tpu.pipeline_mode<synchronous>, transform_indices = @transform_8, window_bounds = array<i64: 1, 128>}, {pipeline_mode = #tpu.pipeline_mode<synchronous>, transform_indices = @transform_9, window_bounds = array<i64: 128, 128>}, {pipeline_mode = #tpu.pipeline_mode<synchronous>, transform_indices = @transform_10, window_bounds = array<i64: 1, 128>}, {transform_indices = @transform_11, window_bounds = array<i64: 8, 128>}]} {
    %c0 = arith.constant 0 : index
    %c0_0 = arith.constant 0 : index
    %0 = vector.load %arg1[%c0, %c0_0] : memref<8x128xbf16, #tpu.memory_space<vmem>>, vector<8x128xbf16>
    %c0_1 = arith.constant 0 : index
    %c0_2 = arith.constant 0 : index
    %1 = vector.load %arg2[%c0_1, %c0_2] : memref<128x128xbf16, #tpu.memory_space<vmem>>, vector<128x128xbf16>
    %cst = arith.constant dense<0.000000e+00> : vector<8x128xf32>
    %2 = tpu.matmul %0, %1, %cst {dimension_numbers = #tpu.dot_dimension_numbers<[1], [0], [0], [1], [0, 0, 1, 1], [], []>} : vector<8x128xbf16>, vector<128x128xbf16>, vector<8x128xf32> -> vector<8x128xf32>
    %c0_3 = arith.constant 0 : index
    %c0_4 = arith.constant 0 : index
    %3 = vector.load %arg3[%c0_3, %c0_4] : memref<1x128xf32, #tpu.memory_space<vmem>>, vector<1x128xf32>
    %4 = vector.broadcast %3 : vector<1x128xf32> to vector<8x128xf32>
    %5 = arith.addf %2, %4 : vector<8x128xf32>
    %cst_5 = arith.constant 0.000000e+00 : f32
    %6 = vector.broadcast %cst_5 : f32 to vector<8x128xf32>
    %7 = arith.maximumf %5, %6 : vector<8x128xf32>
    %8 = arith.truncf %7 : vector<8x128xf32> to vector<8x128xbf16>
    %c0_6 = arith.constant 0 : index
    %c0_7 = arith.constant 0 : index
    %9 = vector.load %arg4[%c0_6, %c0_7] : memref<128x128xbf16, #tpu.memory_space<vmem>>, vector<128x128xbf16>
    %cst_8 = arith.constant dense<0.000000e+00> : vector<8x128xf32>
    %10 = tpu.matmul %8, %9, %cst_8 {dimension_numbers = #tpu.dot_dimension_numbers<[1], [0], [0], [1], [0, 0, 1, 1], [], []>} : vector<8x128xbf16>, vector<128x128xbf16>, vector<8x128xf32> -> vector<8x128xf32>
    %c0_9 = arith.constant 0 : index
    %c0_10 = arith.constant 0 : index
    %11 = vector.load %arg5[%c0_9, %c0_10] : memref<1x128xf32, #tpu.memory_space<vmem>>, vector<1x128xf32>
    %12 = vector.broadcast %11 : vector<1x128xf32> to vector<8x128xf32>
    %13 = arith.addf %10, %12 : vector<8x128xf32>
    %cst_11 = arith.constant 0.000000e+00 : f32
    %14 = vector.broadcast %cst_11 : f32 to vector<8x128xf32>
    %15 = arith.maximumf %13, %14 : vector<8x128xf32>
    %16 = arith.truncf %15 : vector<8x128xf32> to vector<8x128xbf16>
    %c0_12 = arith.constant 0 : index
    %c0_13 = arith.constant 0 : index
    %17 = vector.load %arg6[%c0_12, %c0_13] : memref<128x128xbf16, #tpu.memory_space<vmem>>, vector<128x128xbf16>
    %cst_14 = arith.constant dense<0.000000e+00> : vector<8x128xf32>
    %18 = tpu.matmul %16, %17, %cst_14 {dimension_numbers = #tpu.dot_dimension_numbers<[1], [0], [0], [1], [0, 0, 1, 1], [], []>} : vector<8x128xbf16>, vector<128x128xbf16>, vector<8x128xf32> -> vector<8x128xf32>
    %c0_15 = arith.constant 0 : index
    %c0_16 = arith.constant 0 : index
    %19 = vector.load %arg7[%c0_15, %c0_16] : memref<1x128xf32, #tpu.memory_space<vmem>>, vector<1x128xf32>
    %20 = vector.broadcast %19 : vector<1x128xf32> to vector<8x128xf32>
    %21 = arith.addf %18, %20 : vector<8x128xf32>
    %cst_17 = arith.constant 0.000000e+00 : f32
    %22 = vector.broadcast %cst_17 : f32 to vector<8x128xf32>
    %23 = arith.maximumf %21, %22 : vector<8x128xf32>
    %24 = arith.truncf %23 : vector<8x128xf32> to vector<8x128xbf16>
    %c0_18 = arith.constant 0 : index
    %c0_19 = arith.constant 0 : index
    %25 = vector.load %arg8[%c0_18, %c0_19] : memref<128x128xbf16, #tpu.memory_space<vmem>>, vector<128x128xbf16>
    %cst_20 = arith.constant dense<0.000000e+00> : vector<8x128xf32>
    %26 = tpu.matmul %24, %25, %cst_20 {dimension_numbers = #tpu.dot_dimension_numbers<[1], [0], [0], [1], [0, 0, 1, 1], [], []>} : vector<8x128xbf16>, vector<128x128xbf16>, vector<8x128xf32> -> vector<8x128xf32>
    %c0_21 = arith.constant 0 : index
    %c0_22 = arith.constant 0 : index
    %27 = vector.load %arg9[%c0_21, %c0_22] : memref<1x128xf32, #tpu.memory_space<vmem>>, vector<1x128xf32>
    %28 = vector.broadcast %27 : vector<1x128xf32> to vector<8x128xf32>
    %29 = arith.addf %26, %28 : vector<8x128xf32>
    %cst_23 = arith.constant 0.000000e+00 : f32
    %30 = vector.broadcast %cst_23 : f32 to vector<8x128xf32>
    %31 = arith.maximumf %29, %30 : vector<8x128xf32>
    %32 = arith.truncf %31 : vector<8x128xf32> to vector<8x128xbf16>
    %c0_24 = arith.constant 0 : index
    %c0_25 = arith.constant 0 : index
    %33 = vector.load %arg10[%c0_24, %c0_25] : memref<128x128xbf16, #tpu.memory_space<vmem>>, vector<128x128xbf16>
    %cst_26 = arith.constant dense<0.000000e+00> : vector<8x128xf32>
    %34 = tpu.matmul %32, %33, %cst_26 {dimension_numbers = #tpu.dot_dimension_numbers<[1], [0], [0], [1], [0, 0, 1, 1], [], []>} : vector<8x128xbf16>, vector<128x128xbf16>, vector<8x128xf32> -> vector<8x128xf32>
    %c0_27 = arith.constant 0 : index
    %c0_28 = arith.constant 0 : index
    %35 = vector.load %arg11[%c0_27, %c0_28] : memref<1x128xf32, #tpu.memory_space<vmem>>, vector<1x128xf32>
    %36 = vector.broadcast %35 : vector<1x128xf32> to vector<8x128xf32>
    %37 = arith.addf %34, %36 : vector<8x128xf32>
    %38 = arith.negf %29 : vector<8x128xf32>
    %39 = math.exp %38 : vector<8x128xf32>
    %cst_29 = arith.constant 1.000000e+00 : f32
    %40 = vector.broadcast %cst_29 : f32 to vector<8x128xf32>
    %41 = arith.addf %40, %39 : vector<8x128xf32>
    %42 = arith.divf %40, %41 : vector<8x128xf32>
    %43 = tpu.iota {dimensions = array<i32: 1>} : vector<8x128xi32>
    %c21_i32 = arith.constant 21 : i32
    %44 = vector.broadcast %c21_i32 : i32 to vector<8x128xi32>
    %45 = arith.cmpi slt, %43, %44 : vector<8x128xi32>
    %46 = arith.select %45, %42, %37 : vector<8x128xi1>, vector<8x128xf32>
    %c0_30 = arith.constant 0 : index
    %c0_31 = arith.constant 0 : index
    %47 = vector.load %arg12[%c0_30, %c0_31] : memref<8x128xf32, #tpu.memory_space<vmem>>, vector<8x128xf32>
    tpu.vector_store %arg12[%c0_30, %c0_31], %46 {strides = array<i32>} : memref<8x128xf32, #tpu.memory_space<vmem>>, vector<8x128xf32>,
    return
  }
  func.func @transform_0(%arg0: i32) -> (i32, i32) {
    %c0_i32 = arith.constant 0 : i32
    %c0_i32_0 = arith.constant 0 : i32
    return %arg0, %c0_i32 : i32, i32
  }
  func.func @transform_1(%arg0: i32) -> (i32, i32) {
    %c0_i32 = arith.constant 0 : i32
    %c0_i32_0 = arith.constant 0 : i32
    %c0_i32_1 = arith.constant 0 : i32
    return %c0_i32, %c0_i32_0 : i32, i32
  }
  func.func @transform_2(%arg0: i32) -> (i32, i32) {
    %c0_i32 = arith.constant 0 : i32
    %c0_i32_0 = arith.constant 0 : i32
    %c0_i32_1 = arith.constant 0 : i32
    return %c0_i32, %c0_i32_0 : i32, i32
  }
  func.func @transform_3(%arg0: i32) -> (i32, i32) {
    %c0_i32 = arith.constant 0 : i32
    %c0_i32_0 = arith.constant 0 : i32
    %c0_i32_1 = arith.constant 0 : i32
    return %c0_i32, %c0_i32_0 : i32, i32
  }
  func.func @transform_4(%arg0: i32) -> (i32, i32) {
    %c0_i32 = arith.constant 0 : i32
    %c0_i32_0 = arith.constant 0 : i32
    %c0_i32_1 = arith.constant 0 : i32
    return %c0_i32, %c0_i32_0 : i32, i32
  }
  func.func @transform_5(%arg0: i32) -> (i32, i32) {
    %c0_i32 = arith.constant 0 : i32
    %c0_i32_0 = arith.constant 0 : i32
    %c0_i32_1 = arith.constant 0 : i32
    return %c0_i32, %c0_i32_0 : i32, i32
  }
  func.func @transform_6(%arg0: i32) -> (i32, i32) {
    %c0_i32 = arith.constant 0 : i32
    %c0_i32_0 = arith.constant 0 : i32
    %c0_i32_1 = arith.constant 0 : i32
    return %c0_i32, %c0_i32_0 : i32, i32
  }
  func.func @transform_7(%arg0: i32) -> (i32, i32) {
    %c0_i32 = arith.constant 0 : i32
    %c0_i32_0 = arith.constant 0 : i32
    %c0_i32_1 = arith.constant 0 : i32
    return %c0_i32, %c0_i32_0 : i32, i32
  }
  func.func @transform_8(%arg0: i32) -> (i32, i32) {
    %c0_i32 = arith.constant 0 : i32
    %c0_i32_0 = arith.constant 0 : i32
    %c0_i32_1 = arith.constant 0 : i32
    return %c0_i32, %c0_i32_0 : i32, i32
  }
  func.func @transform_9(%arg0: i32) -> (i32, i32) {
    %c0_i32 = arith.constant 0 : i32
    %c0_i32_0 = arith.constant 0 : i32
    %c0_i32_1 = arith.constant 0 : i32
    return %c0_i32, %c0_i32_0 : i32, i32
  }
  func.func @transform_10(%arg0: i32) -> (i32, i32) {
    %c0_i32 = arith.constant 0 : i32
    %c0_i32_0 = arith.constant 0 : i32
    %c0_i32_1 = arith.constant 0 : i32
    return %c0_i32, %c0_i32_0 : i32, i32
  }
  func.func @transform_11(%arg0: i32) -> (i32, i32) {
    %c0_i32 = arith.constant 0 : i32
    %c0_i32_0 = arith.constant 0 : i32
    return %arg0, %c0_i32 : i32, i32
  }
}

</mosaic_0001>

<bundles_post_ra>
// kernel: tpu_custom_call.1
= control target key start
LH: loop header
LB: loop body
LE: loop exit
PB: predicated region body
PF: predicated region fallthrough
CT: control target
= control target key end

     0   :  { %16 = vsyncpa [#allocation3], 0  ;;  %s1358_s0 = inlined_call_operand.hbm [shape: bf16[8,128], index: 0, kind: input, shape index: {}]   ;;  %s1359_s1 = inlined_call_operand.hbm [shape: bf16[128,128], index: 1, kind: input, shape index: {}]   ;;  %s1360_s2 = inlined_call_operand.vmem [shape: f32[1,128], index: 2, kind: input, shape index: {}]   ;;  %s1361_s3 = inlined_call_operand.hbm [shape: bf16[128,128], index: 3, kind: input, shape index: {}]   ;;  %s1362_s4 = inlined_call_operand.vmem [shape: f32[1,128], index: 4, kind: input, shape index: {}]   ;;  %s1363_s5 = inlined_call_operand.hbm [shape: bf16[128,128], index: 5, kind: input, shape index: {}]   ;;  %s1364_s6 = inlined_call_operand.vmem [shape: f32[1,128], index: 6, kind: input, shape index: {}]   ;;  %s1365_s7 = inlined_call_operand.hbm [shape: bf16[128,128], index: 7, kind: input, shape index: {}]   ;;  %s1366_s8 = inlined_call_operand.vmem [shape: f32[1,128], index: 8, kind: input, shape index: {}]   ;;  %s1367_s9 = inlined_call_operand.hbm [shape: bf16[128,128], index: 9, kind: input, shape index: {}]   ;;  %s1368_s10 = inlined_call_operand.vmem [shape: f32[1,128], index: 10, kind: input, shape index: {}]   ;;  %s1369_s11 = inlined_call_operand.hbm [shape: f32[8,128], index: 11, kind: output, shape index: {}]  }
   0x1   :  { %17 = vsyncpa [#allocation6], 0 }
   0x2   :  { %18 = vsyncpa [#allocation9], 0 }
   0x3   :  { %19 = vsyncpa [#allocation12], 0 }
   0x4   :  { %20 = vsyncpa [#allocation4], 0  ;;  %s1123_s17 = smov [#allocation5]   ;;  %s959_s21 = scalar_lea.hbm %s1359_s1, 1024 }
   0x5   :  { %s36_s18 = sshll.u32 %s1123_s17, 4  ;;  %p960_p0 = scmp.ne.s32.totalorder %s1359_s1, %s959_s21  ;;  %s37_s18 = int_to_ptr.vmem [resolvable:$true] %s36_s18 }
   0x6   :  { %p963_p1 = scmp.lt.u32.totalorder %s959_s21, %s1359_s1 }
   0x8   :  { %p965_p2 = pnand %p963_p1, %p960_p0 }
   0xa   :  { %968 = shalt.err (!%p965_p2)
}
   0xb   :  { %s969_s26 = scalar_lea.vmem %s37_s18, 1024  ;;  %p974_p4 = scmp.lt.s32.totalorder %s37_s18, %s37_s18 }
   0xc   :  { %p970_p3 = scmp.ne.s32.totalorder %s37_s18, %s969_s26  ;;  %p975_p5 = scmp.lt.s32.totalorder %s969_s26, %s969_s26 }
   0xe   :  { %p976_p6 = por %p975_p5, %p974_p4 }
  0x10   :  { %p977_p7 = pnand %p976_p6, %p970_p3 }
  0x12   :  { %980 = shalt.err (!%p977_p7)
}
  0x13   :  { %s1124_s27 = smov 64   ;;  %s1125_s28 = smov 4  }
  0x14   :  { %42 = dma.hbm_to_vmem [thread:$0]  %s1359_s1, 1024, %s37_s18, [#allocation6], %s1124_s27, %s1124_s27, %s1125_s28  }
  0x15   :  { %s1126_s12 = smov [#allocation8]   ;;  %s1127_s14 = smov [#allocation2]  }
  0x16   :  { %s64_s13 = sshll.u32 %s1126_s12, 4  ;;  %s27_s15 = sshll.u32 %s1127_s14, 4  ;;  %s65_s13 = int_to_ptr.vmem [resolvable:$true] %s64_s13  ;;  %s28_s15 = int_to_ptr.vmem [resolvable:$true] %s27_s15 }
  0x17   :  { %s981_s19 = scalar_lea.hbm %s1363_s5, 1024 }
  0x18   :  { %p982_p8 = scmp.ne.s32.totalorder %s1363_s5, %s981_s19  ;;  %p985_p9 = scmp.lt.u32.totalorder %s981_s19, %s1363_s5 }
  0x1a   :  { %p987_p10 = pnand %p985_p9, %p982_p8 }
  0x1c   :  { %990 = shalt.err (!%p987_p10)
}
  0x1d   :  { %s991_s1 = scalar_lea.vmem %s65_s13, 1024  ;;  %p996_p12 = scmp.lt.s32.totalorder %s65_s13, %s65_s13 }
  0x1e   :  { %p992_p11 = scmp.ne.s32.totalorder %s65_s13, %s991_s1  ;;  %p997_p13 = scmp.lt.s32.totalorder %s991_s1, %s991_s1 }
  0x20   :  { %p998_p0 = por %p997_p13, %p996_p12 }
  0x22   :  { %p999_p1 = pnand %p998_p0, %p992_p11 }
  0x24   :  { %1002 = shalt.err (!%p999_p1)
}
  0x25   :  { %70 = dma.hbm_to_vmem [thread:$0]  %s1363_s5, 1024, %s65_s13, [#allocation9], %s1124_s27, %s1124_s27, %s1125_s28  }
  0x26   :  { %s1003_s29 = scalar_lea.hbm %s1358_s0, 64 }
  0x27   :  { %p1004_p2 = scmp.ne.s32.totalorder %s1358_s0, %s1003_s29  ;;  %p1007_p3 = scmp.lt.u32.totalorder %s1003_s29, %s1358_s0 }
  0x29   :  { %p1009_p4 = pnand %p1007_p3, %p1004_p2 }
  0x2b   :  { %1012 = shalt.err (!%p1009_p4)
}
  0x2c   :  { %s1013_s17 = scalar_lea.vmem %s28_s15, 64  ;;  %p1018_p6 = scmp.lt.s32.totalorder %s28_s15, %s28_s15 }
  0x2d   :  { %p1014_p5 = scmp.ne.s32.totalorder %s28_s15, %s1013_s17  ;;  %p1019_p7 = scmp.lt.s32.totalorder %s1013_s17, %s1013_s17 }
  0x2f   :  { %p1020_p8 = por %p1019_p7, %p1018_p6 }
  0x31   :  { %p1021_p9 = pnand %p1020_p8, %p1014_p5 }
  0x33   :  { %1024 = shalt.err (!%p1021_p9)
}
  0x34   :  { %30 = dma.hbm_to_vmem [thread:$0]  %s1358_s0, 64, %s28_s15, [#allocation3]  }
  0x35   :  { %s1128_s19 = smov [#allocation7]   ;;  %s1129_s21 = smov [#allocation10]  }
  0x36   :  { %s50_s20 = sshll.u32 %s1128_s19, 4  ;;  %s78_s22 = sshll.u32 %s1129_s21, 4  ;;  %s51_s20 = int_to_ptr.vmem [resolvable:$true] %s50_s20  ;;  %s79_s22 = int_to_ptr.vmem [resolvable:$true] %s78_s22 }
  0x37   :  { %s1025_s18 = scalar_lea.hbm %s1361_s3, 1024 }
  0x38   :  { %p1026_p10 = scmp.ne.s32.totalorder %s1361_s3, %s1025_s18  ;;  %p1029_p11 = scmp.lt.u32.totalorder %s1025_s18, %s1361_s3 }
  0x3a   :  { %p1031_p12 = pnand %p1029_p11, %p1026_p10 }
  0x3c   :  { %1034 = shalt.err (!%p1031_p12)
}
  0x3d   :  { %s1035_s0 = scalar_lea.vmem %s51_s20, 1024  ;;  %p1040_p0 = scmp.lt.s32.totalorder %s51_s20, %s51_s20 }
  0x3e   :  { %p1036_p13 = scmp.ne.s32.totalorder %s51_s20, %s1035_s0  ;;  %p1041_p1 = scmp.lt.s32.totalorder %s1035_s0, %s1035_s0 }
  0x40   :  { %p1042_p2 = por %p1041_p1, %p1040_p0 }
  0x42   :  { %p1043_p3 = pnand %p1042_p2, %p1036_p13 }
  0x44   :  { %1046 = shalt.err (!%p1043_p3)
}
  0x45   :  { %56 = dma.hbm_to_vmem [thread:$0]  %s1361_s3, 1024, %s51_s20, [#allocation6], %s1124_s27, %s1124_s27, %s1125_s28  }
  0x46   :  { %s1047_s16 = scalar_lea.hbm %s1365_s7, 1024 }
  0x47   :  { %p1048_p4 = scmp.ne.s32.totalorder %s1365_s7, %s1047_s16  ;;  %p1051_p5 = scmp.lt.u32.totalorder %s1047_s16, %s1365_s7 }
  0x49   :  { %p1053_p6 = pnand %p1051_p5, %p1048_p4 }
  0x4b   :  { %1056 = shalt.err (!%p1053_p6)
}
  0x4c   :  { %s1057_s21 = scalar_lea.vmem %s79_s22, 1024  ;;  %p1062_p8 = scmp.lt.s32.totalorder %s79_s22, %s79_s22 }
  0x4d   :  { %p1058_p7 = scmp.ne.s32.totalorder %s79_s22, %s1057_s21  ;;  %p1063_p9 = scmp.lt.s32.totalorder %s1057_s21, %s1057_s21 }
  0x4f   :  { %p1064_p10 = por %p1063_p9, %p1062_p8 }
  0x51   :  { %p1065_p11 = pnand %p1064_p10, %p1058_p7 }
  0x53   :  { %1068 = shalt.err (!%p1065_p11)
}
  0x54   :  { %84 = dma.hbm_to_vmem [thread:$0]  %s1365_s7, 1024, %s79_s22, [#allocation9], %s1124_s27, %s1124_s27, %s1125_s28  }
  0x55   :  { %s1130_s23 = smov [#allocation11]   ;;  %s1069_s25 = scalar_lea.hbm %s1367_s9, 1024 }
  0x56   :  { %s92_s1 = sshll.u32 %s1130_s23, 4  ;;  %p1070_p12 = scmp.ne.s32.totalorder %s1367_s9, %s1069_s25  ;;  %s93_s1 = int_to_ptr.vmem [resolvable:$true] %s92_s1 }
  0x57   :  { %p1073_p13 = scmp.lt.u32.totalorder %s1069_s25, %s1367_s9 }
  0x59   :  { %p1075_p0 = pnand %p1073_p13, %p1070_p12 }
  0x5b   :  { %1078 = shalt.err (!%p1075_p0)
}
  0x5c   :  { %s1079_s30 = scalar_lea.vmem %s93_s1, 1024  ;;  %p1084_p2 = scmp.lt.s32.totalorder %s93_s1, %s93_s1 }
  0x5d   :  { %p1080_p1 = scmp.ne.s32.totalorder %s93_s1, %s1079_s30  ;;  %p1085_p3 = scmp.lt.s32.totalorder %s1079_s30, %s1079_s30 }
  0x5f   :  { %p1086_p4 = por %p1085_p3, %p1084_p2 }
  0x61   :  { %p1087_p5 = pnand %p1086_p4, %p1080_p1 }
  0x63   :  { %1090 = shalt.err (!%p1087_p5)
}
  0x64   :  { %98 = dma.hbm_to_vmem [thread:$0]  %s1367_s9, 1024, %s93_s1, [#allocation12], %s1124_s27, %s1124_s27, %s1125_s28  }
  0x65   :  { %1113 = dma.done.wait [#allocation3], 64  }
  0x66   :  { %1114 = vsyncadd [#allocation3], 4294967232 }
  0x67   :  { %1115 = dma.done.wait [#allocation6], 2048  }
  0x68   :  { %1116 = vsyncadd [#allocation6], 4294965248 }
  0x69   :  { %1117 = dma.done.wait [#allocation9], 2048  }
  0x6a   :  { %1118 = vsyncadd [#allocation9], 4294965248 }
  0x6b   :  { %1119 = dma.done.wait [#allocation12], 1024  }
  0x6c   :  { %1120 = vsyncadd [#allocation12], 4294966272  ;;  %v1131_v0 = vmov 0.0   ;;  %vm1132_vm0 = vmmov 0   ;;  %v915_v1 = vld [vmem:[#allocation5] sm:$0xff]   ;;  %v916_v2 = vld [vmem:[#allocation5 + $0x8] sm:$0xff]  }
  0x6d   :  { %804 = vmatprep.subr.bf16.mxu0 %v1131_v0  ;;  %820 = vmatprep.mubr.msk.bf16.mxu0 %vm1132_vm0, %v1131_v0  ;;  %v917_v3 = vld [vmem:[#allocation5 + $0x10] sm:$0xff]   ;;  %v923_v4 = vld [vmem:[#allocation7] sm:$0xff]   ;;  %v918_v5 = vld [vmem:[#allocation5 + $0x18] sm:$0xff]  }
  0x6e   :  { %824 = vmatprep.subr.bf16.mxu1 %v1131_v0  ;;  %840 = vmatprep.mubr.msk.bf16.mxu1 %vm1132_vm0, %v1131_v0  ;;  %v924_v6 = vld [vmem:[#allocation7 + $0x8] sm:$0xff]   ;;  %v919_v7 = vld [vmem:[#allocation5 + $0x20] sm:$0xff]   ;;  %v925_v8 = vld [vmem:[#allocation7 + $0x10] sm:$0xff]  }
  0x6f   :  { %805 = vmatpush3.bf16.msra.mxu0 %v915_v1  ;;  %825 = vmatpush3.bf16.msra.mxu1 %v923_v4  ;;  %v920_v9 = vld [vmem:[#allocation5 + $0x28] sm:$0xff]   ;;  %v926_v10 = vld [vmem:[#allocation7 + $0x18] sm:$0xff]   ;;  %v921_v11 = vld [vmem:[#allocation5 + $0x30] sm:$0xff]  }
  0x70   :  { %806 = vmatprep.subr.bf16.mxu0 %v1131_v0  ;;  %826 = vmatprep.subr.bf16.mxu1 %v1131_v0  ;;  %v927_v12 = vld [vmem:[#allocation7 + $0x20] sm:$0xff]   ;;  %v922_v13 = vld [vmem:[#allocation5 + $0x38] sm:$0xff]   ;;  %v928_v14 = vld [vmem:[#allocation7 + $0x28] sm:$0xff]  }
  0x71   :  { %v120_v15 = vld [vmem:[#allocation2] sm:$0xf]  ;;  %v929_v16 = vld [vmem:[#allocation7 + $0x30] sm:$0xff]   ;;  %v931_v18 = vld [vmem:[#allocation8] sm:$0xff]  }
  0x72   :  { %v930_v17 = vld [vmem:[#allocation7 + $0x38] sm:$0xff]   ;;  %v932_v19 = vld [vmem:[#allocation8 + $0x8] sm:$0xff]   ;;  %v933_v20 = vld [vmem:[#allocation8 + $0x10] sm:$0xff]  }
  0x73   :  { %807 = vmatpush3.bf16.msra.mxu0 %v916_v2  ;;  %827 = vmatpush3.bf16.msra.mxu1 %v924_v6  ;;  %v934_v21 = vld [vmem:[#allocation8 + $0x18] sm:$0xff]   ;;  %v935_v22 = vld [vmem:[#allocation8 + $0x20] sm:$0xff]   ;;  %v936_v23 = vld [vmem:[#allocation8 + $0x28] sm:$0xff]  }
  0x74   :  { %808 = vmatprep.subr.bf16.mxu0 %v1131_v0  ;;  %828 = vmatprep.subr.bf16.mxu1 %v1131_v0  ;;  %v713_v24 = vld [vmem:[%s1360_s2] ss:$0 sm:$0xff]  ;;  %v937_v32 = vld [vmem:[#allocation8 + $0x30] sm:$0xff]   ;;  %v939_v34 = vld [vmem:[#allocation10] sm:$0xff]  }
  0x75   :  { %v938_v33 = vld [vmem:[#allocation8 + $0x38] sm:$0xff]   ;;  %v940_v35 = vld [vmem:[#allocation10 + $0x8] sm:$0xff]   ;;  %v941_v36 = vld [vmem:[#allocation10 + $0x10] sm:$0xff]  }
  0x76   :  { %v942_v37 = vld [vmem:[#allocation10 + $0x18] sm:$0xff]   ;;  %v943_v38 = vld [vmem:[#allocation10 + $0x20] sm:$0xff]   ;;  %v944_v39 = vld [vmem:[#allocation10 + $0x28] sm:$0xff]  }
  0x77   :  { %809 = vmatpush3.bf16.msra.mxu0 %v917_v3  ;;  %829 = vmatpush3.bf16.msra.mxu1 %v925_v8  ;;  %v722_v40 = vld [vmem:[%s1362_s4] ss:$0 sm:$0xff]  ;;  %v945_v48 = vld [vmem:[#allocation10 + $0x30] sm:$0xff]   ;;  %v947_v50 = vld [vmem:[#allocation11] sm:$0xff]  }
  0x78   :  { %810 = vmatprep.subr.bf16.mxu0 %v1131_v0  ;;  %830 = vmatprep.subr.bf16.mxu1 %v1131_v0  ;;  %v946_v49 = vld [vmem:[#allocation10 + $0x38] sm:$0xff]   ;;  %v948_v51 = vld [vmem:[#allocation11 + $0x8] sm:$0xff]   ;;  %v949_v52 = vld [vmem:[#allocation11 + $0x10] sm:$0xff]  }
  0x79   :  { %v950_v53 = vld [vmem:[#allocation11 + $0x18] sm:$0xff]   ;;  %v951_v54 = vld [vmem:[#allocation11 + $0x20] sm:$0xff]   ;;  %v952_v55 = vld [vmem:[#allocation11 + $0x28] sm:$0xff]  }
  0x7a   :  { %v731_v56 = vld [vmem:[%s1364_s6] ss:$0 sm:$0xff]  ;;  %v953_v1 = vld [vmem:[#allocation11 + $0x30] sm:$0xff]  }
  0x7b   :  { %811 = vmatpush3.bf16.msra.mxu0 %v918_v5  ;;  %831 = vmatpush3.bf16.msra.mxu1 %v926_v10  ;;  %v954_v2 = vld [vmem:[#allocation11 + $0x38] sm:$0xff]  }
  0x7c   :  { %812 = vmatprep.subr.bf16.mxu0 %v1131_v0  ;;  %832 = vmatprep.subr.bf16.mxu1 %v1131_v0  ;;  %v740_v3 = vld [vmem:[%s1366_s8] ss:$0 sm:$0xff]  ;;  %s1133_s8 = smov [#allocation13]  }
  0x7d   :  { %s701_s5 = sshll.u32 %s1133_s8, 4  ;;  %s702_s5 = int_to_ptr.vmem [resolvable:$true] %s701_s5 }
  0x7e   :  { %s1091_s13 = scalar_lea.vmem %s702_s5, 128  ;;  %p1096_p7 = scmp.lt.s32.totalorder %s702_s5, %s702_s5 }
  0x7f   :  { %813 = vmatpush3.bf16.msra.mxu0 %v919_v7  ;;  %833 = vmatpush3.bf16.msra.mxu1 %v927_v12  ;;  %p1092_p6 = scmp.ne.s32.totalorder %s702_s5, %s1091_s13  ;;  %p1097_p8 = scmp.lt.s32.totalorder %s1091_s13, %s1091_s13 }
  0x80   :  { %814 = vmatprep.subr.bf16.mxu0 %v1131_v0  ;;  %834 = vmatprep.subr.bf16.mxu1 %v1131_v0 }
  0x81   :  { %p1098_p9 = por %p1097_p8, %p1096_p7 }
  0x83   :  { %815 = vmatpush3.bf16.msra.mxu0 %v920_v9  ;;  %835 = vmatpush3.bf16.msra.mxu1 %v928_v14  ;;  %p1099_p10 = pnand %p1098_p9, %p1092_p6 }
  0x84   :  { %816 = vmatprep.subr.bf16.mxu0 %v1131_v0  ;;  %836 = vmatprep.subr.bf16.mxu1 %v1131_v0 }
  0x87   :  { %817 = vmatpush3.bf16.msra.mxu0 %v921_v11  ;;  %837 = vmatpush3.bf16.msra.mxu1 %v929_v16 }
  0x88   :  { %818 = vmatprep.subr.bf16.mxu0 %v1131_v0  ;;  %838 = vmatprep.subr.bf16.mxu1 %v1131_v0 }
  0x8b   :  { %819 = vmatpush3.bf16.msra.mxu0 %v922_v13  ;;  %839 = vmatpush3.bf16.msra.mxu1 %v930_v17 }
  0x8c   :  { %844 = vmatprep.subr.bf16.mxu0 %v1131_v0  ;;  %864 = vmatprep.subr.bf16.mxu1 %v1131_v0 }
  0x8e   :  { %821 = vmatmul.mubr.bf16.vlgmr.msra.gmra.mrb[0].mxu0 %v120_v15  ;;  %v749_v15 = vld [vmem:[%s1368_s10] ss:$0 sm:$0xff] }
  0x8f   :  { %860 = vmatprep.mubr.msk.bf16.mxu0 %vm1132_vm0, %v1131_v0  ;;  %845 = vmatpush3.bf16.msra.mxu0 %v931_v18 }
  0x90   :  { %846 = vmatprep.subr.bf16.mxu0 %v1131_v0 }
  0x93   :  { %847 = vmatpush3.bf16.msra.mxu0 %v932_v19 }
  0x94   :  { %848 = vmatprep.subr.bf16.mxu0 %v1131_v0 }
  0x97   :  { %849 = vmatpush3.bf16.msra.mxu0 %v933_v20 }
  0x98   :  { %850 = vmatprep.subr.bf16.mxu0 %v1131_v0 }
  0x9b   :  { %851 = vmatpush3.bf16.msra.mxu0 %v934_v21 }
  0x9c   :  { %852 = vmatprep.subr.bf16.mxu0 %v1131_v0 }
  0x9f   :  { %853 = vmatpush3.bf16.msra.mxu0 %v935_v22 }
  0xa0   :  { %854 = vmatprep.subr.bf16.mxu0 %v1131_v0 }
  0xa3   :  { %855 = vmatpush3.bf16.msra.mxu0 %v936_v23 }
  0xa4   :  { %856 = vmatprep.subr.bf16.mxu0 %v1131_v0 }
  0xa7   :  { %857 = vmatpush3.bf16.msra.mxu0 %v937_v32 }
  0xa8   :  { %858 = vmatprep.subr.bf16.mxu0 %v1131_v0 }
  0xab   :  { %859 = vmatpush3.bf16.msra.mxu0 %v938_v33 }
  0xac   :  { %884 = vmatprep.subr.bf16.mxu0 %v1131_v0 }
 0x161   :  { %v226_v25 = vpop.f32.mrb[0].mxu0 }
 0x162   :  { %v227_v26 = vadd.f32 %v713_v24, %v226_v25  ;;  %v822_v27 = vpop.f32.mrb[1].mxu0 }
 0x163   :  { %v229_v28 = vpop.f32.mrb[2].mxu0 }
 0x164   :  { %v232_v29 = vmax.f32 %v227_v26, 0.0  ;;  %v823_v30 = vpop.f32.mrb[3].mxu0 }
 0x166   :  { %v233_v31 = vpack.c.bf16 %v232_v29, %v232_v29 }
 0x168   :  { %841 = vmatmul.mubr.bf16.vlgmr.msra.gmra.mrb[0].mxu1 %v233_v31 }
 0x169   :  { %880 = vmatprep.mubr.msk.bf16.mxu1 %vm1132_vm0, %v1131_v0  ;;  %865 = vmatpush3.bf16.msra.mxu1 %v939_v34 }
 0x16a   :  { %866 = vmatprep.subr.bf16.mxu1 %v1131_v0 }
 0x16d   :  { %867 = vmatpush3.bf16.msra.mxu1 %v940_v35 }
 0x16e   :  { %868 = vmatprep.subr.bf16.mxu1 %v1131_v0 }
 0x171   :  { %869 = vmatpush3.bf16.msra.mxu1 %v941_v36 }
 0x172   :  { %870 = vmatprep.subr.bf16.mxu1 %v1131_v0 }
 0x175   :  { %871 = vmatpush3.bf16.msra.mxu1 %v942_v37 }
 0x176   :  { %872 = vmatprep.subr.bf16.mxu1 %v1131_v0 }
 0x179   :  { %873 = vmatpush3.bf16.msra.mxu1 %v943_v38 }
 0x17a   :  { %874 = vmatprep.subr.bf16.mxu1 %v1131_v0 }
 0x17d   :  { %875 = vmatpush3.bf16.msra.mxu1 %v944_v39 }
 0x17e   :  { %876 = vmatprep.subr.bf16.mxu1 %v1131_v0 }
 0x181   :  { %877 = vmatpush3.bf16.msra.mxu1 %v945_v48 }
 0x182   :  { %878 = vmatprep.subr.bf16.mxu1 %v1131_v0 }
 0x185   :  { %879 = vmatpush3.bf16.msra.mxu1 %v946_v49 }
 0x23b   :  { %v339_v41 = vpop.f32.mrb[0].mxu1 }
 0x23c   :  { %v340_v42 = vadd.f32 %v722_v40, %v339_v41  ;;  %v842_v43 = vpop.f32.mrb[1].mxu1 }
 0x23d   :  { %v342_v44 = vpop.f32.mrb[2].mxu1 }
 0x23e   :  { %v345_v45 = vmax.f32 %v340_v42, 0.0  ;;  %v843_v46 = vpop.f32.mrb[3].mxu1 }
 0x240   :  { %v346_v47 = vpack.c.bf16 %v345_v45, %v345_v45 }
 0x242   :  { %861 = vmatmul.mubr.bf16.vlgmr.msra.gmra.mrb[4].mxu0 %v346_v47 }
 0x243   :  { %900 = vmatprep.mubr.msk.bf16.mxu0 %vm1132_vm0, %v1131_v0  ;;  %885 = vmatpush3.bf16.msra.mxu0 %v947_v50 }
 0x244   :  { %886 = vmatprep.subr.bf16.mxu0 %v1131_v0 }
 0x247   :  { %887 = vmatpush3.bf16.msra.mxu0 %v948_v51 }
 0x248   :  { %888 = vmatprep.subr.bf16.mxu0 %v1131_v0 }
 0x24b   :  { %889 = vmatpush3.bf16.msra.mxu0 %v949_v52 }
 0x24c   :  { %890 = vmatprep.subr.bf16.mxu0 %v1131_v0 }
 0x24f   :  { %891 = vmatpush3.bf16.msra.mxu0 %v950_v53 }
 0x250   :  { %892 = vmatprep.subr.bf16.mxu0 %v1131_v0 }
 0x253   :  { %893 = vmatpush3.bf16.msra.mxu0 %v951_v54 }
 0x254   :  { %894 = vmatprep.subr.bf16.mxu0 %v1131_v0 }
 0x257   :  { %895 = vmatpush3.bf16.msra.mxu0 %v952_v55 }
 0x258   :  { %896 = vmatprep.subr.bf16.mxu0 %v1131_v0 }
 0x25b   :  { %897 = vmatpush3.bf16.msra.mxu0 %v953_v1 }
 0x25c   :  { %898 = vmatprep.subr.bf16.mxu0 %v1131_v0  ;;  %v690_v0 = vlaneseq }
 0x25e   :  { %v691_v14 = vand.u32 127, %v690_v0 }
 0x25f   :  { %899 = vmatpush3.bf16.msra.mxu0 %v954_v2 }
 0x260   :  { %vm692_vm1 = vcmp.lt.s32.totalorder %v691_v14, 21 }
 0x315   :  { %v452_v57 = vpop.f32.mrb[4].mxu0 }
 0x316   :  { %v453_v58 = vadd.f32 %v731_v56, %v452_v57  ;;  %v862_v59 = vpop.f32.mrb[5].mxu0 }
 0x317   :  { %v455_v60 = vpop.f32.mrb[6].mxu0 }
 0x318   :  { %v458_v61 = vmax.f32 %v453_v58, 0.0  ;;  %v863_v62 = vpop.f32.mrb[7].mxu0 }
 0x31a   :  { %v459_v63 = vpack.c.bf16 %v458_v61, %v458_v61 }
 0x31c   :  { %881 = vmatmul.mubr.bf16.vlgmr.msra.gmra.mrb[4].mxu1 %v459_v63 }
 0x3ef   :  { %v565_v4 = vpop.f32.mrb[4].mxu1 }
 0x3f0   :  { %v566_v5 = vadd.f32 %v740_v3, %v565_v4  ;;  %v882_v6 = vpop.f32.mrb[5].mxu1 }
 0x3f1   :  { %v568_v7 = vpop.f32.mrb[6].mxu1 }
 0x3f2   :  { %v571_v8 = vmax.f32 %v566_v5, 0.0  ;;  %v883_v9 = vpop.f32.mrb[7].mxu1  ;;  %v758_v11 = vmul.f32 -1.442695, %v566_v5 }
 0x3f4   :  { %v572_v10 = vpack.c.bf16 %v571_v8, %v571_v8  ;;  %955 = vpow2.f32 %v758_v11 }
 0x3f6   :  { %901 = vmatmul.mubr.bf16.vlgmr.msra.gmra.mrb[8].mxu0 %v572_v10 }
 0x3fe   :  { %v956_v12 = vpop.eup %955 }
 0x3ff   :  { %v687_v13 = vadd.f32 1.0, %v956_v12 }
 0x401   :  { %957 = vrcp.f32 %v687_v13 }
 0x40b   :  { %v958_v19 = vpop.eup %957 }
 0x4c9   :  { %v678_v16 = vpop.f32.mrb[8].mxu0 }
 0x4ca   :  { %v679_v17 = vadd.f32 %v749_v15, %v678_v16  ;;  %v902_v18 = vpop.f32.mrb[9].mxu0 }
 0x4cb   :  { %v681_v20 = vpop.f32.mrb[10].mxu0 }
 0x4cc   :  { %v903_v21 = vpop.f32.mrb[11].mxu0  ;;  %v693_v22 = vsel %vm692_vm1, %v958_v19, %v679_v17 }
 0x4cd   :  { %694 = vst [vmem:[#allocation13] sm:$0xff] %v693_v22 }
 0x4ce   :  { %1102 = shalt.err (!%p1099_p10)
}
 0x4cf   :  { %s1103_s21 = scalar_lea.hbm %s1369_s11, 128 }
 0x4d0   :  { %p1104_p11 = scmp.ne.s32.totalorder %s1369_s11, %s1103_s21  ;;  %p1107_p12 = scmp.lt.u32.totalorder %s1103_s21, %s1369_s11 }
 0x4d2   :  { %p1109_p13 = pnand %p1107_p12, %p1104_p11 }
 0x4d4   :  { %1112 = shalt.err (!%p1109_p13)
}
 0x4d5   :  { %704 = dma.vmem_to_hbm [thread:$0]  %s702_s5, 128, %s1369_s11, [#allocation4]  }
 0x4d6   :  { %1121 = dma.done.wait [#allocation4], 128  }
 0x4d7   :  { %1122 = vsyncadd [#allocation4], 4294967168 }
 0x4d8   :  { %708 = vsyncpa [#allocation3], 1 }
 0x4d9   :  { %709 = vsyncpa [#allocation6], 1 }
 0x4da   :  { %710 = vsyncpa [#allocation9], 1 }
 0x4db   :  { %711 = vsyncpa [#allocation12], 1 }
 0x4dc   :  { %712 = vsyncpa [#allocation4], 1 }

</bundles_post_ra>
